<compile_context>
chip_gen: v7x
topology: tpu7x:2x2x1
jax: 0.10.0
libtpu: 0.0.40
codegen_flags: <defaults>
</compile_context>

<pallas_src>
import jax
import jax.numpy as jnp
from jax import lax
from jax.experimental import pallas as pl
from jax.experimental.pallas import tpu as pltpu


LANES = 128      # vreg lane width
SUBLANES = 8     # vreg sublane count (f32)


def _round_up(x, m):
    return ((x + m - 1) // m) * m


# --------------------------------------------------------------------------
# Kernel A: fused ReLU + conv-as-matmul (MXU) + per-block BN partial stats.
# --------------------------------------------------------------------------
def relu_matmul_stats_kernel(p_ref, w_ref, o_ref, psum_ref, psq_ref):
    # ReLU happens before the conv (nn.ReLU -> nn.Conv3d). Padded rows/cols are
    # zero, so they contribute nothing to the matmul or to the statistics.
    p = jnp.maximum(p_ref[...], 0)                                   # bf16 (tm, Kp)
    acc = jnp.dot(p, w_ref[...], preferred_element_type=jnp.float32)  # f32 (tm, Cp)
    o_ref[...] = acc

    cp = acc.shape[1]
    s = jnp.sum(acc, axis=0, keepdims=True)                          # (1, Cp)
    sq = jnp.sum(acc * acc, axis=0, keepdims=True)                   # (1, Cp)
    # Broadcast to a full (8, Cp) sublane tile so the stats store is aligned.
    psum_ref[...] = jnp.broadcast_to(s, (SUBLANES, cp))
    psq_ref[...] = jnp.broadcast_to(sq, (SUBLANES, cp))


# --------------------------------------------------------------------------
# Kernel B: tiled BatchNorm apply (per-channel affine with precomputed
# scale/shift); lane-dense, pipelined over M.
# --------------------------------------------------------------------------
def bn_apply_kernel(x_ref, scale_ref, shift_ref, o_ref):
    o_ref[...] = x_ref[...] * scale_ref[...] + shift_ref[...]


# --------------------------------------------------------------------------
# Wrapper: im2col glue in plain JAX, compute in Pallas.
# --------------------------------------------------------------------------
def relu_conv_bn_3d(x, w, gamma, beta, *, stride, padding, eps=1e-5, tm=512):
    N, C_in, D, H, W = x.shape
    C_out, _, kD, kH, kW = w.shape

    Do = (D + 2 * padding - kD) // stride + 1
    Ho = (H + 2 * padding - kH) // stride + 1
    Wo = (W + 2 * padding - kW) // stride + 1

    M = N * Do * Ho * Wo
    K = kD * kH * kW * C_in

    # ---- im2col (wrapper glue, bf16 to halve HBM traffic into the matmul) ----
    # TODO(synk): fold im2col into the kernel's DMA (per-tap slabs of the padded
    # channels-last input via data-dependent index_maps / manual copies) so the
    # input is read once per tap instead of materializing the kD*kH*kW-expanded
    # matrix in HBM.
    x_cl = jnp.transpose(x, (0, 2, 3, 4, 1))                          # (N, D, H, W, C_in)
    xp = jnp.pad(x_cl, ((0, 0),
                        (padding, padding),
                        (padding, padding),
                        (padding, padding),
                        (0, 0)))
    cols = []
    for kd in range(kD):
        for kh in range(kH):
            for kw in range(kW):
                cols.append(xp[:,
                               kd:kd + (Do - 1) * stride + 1:stride,
                               kh:kh + (Ho - 1) * stride + 1:stride,
                               kw:kw + (Wo - 1) * stride + 1:stride,
                               :])
    patches = jnp.concatenate(cols, axis=-1).reshape(M, K).astype(jnp.bfloat16)

    # weight (C_out, C_in, kD, kH, kW) -> (kD, kH, kW, C_in, C_out) -> (K, C_out)
    w2 = jnp.transpose(w, (2, 3, 4, 1, 0)).reshape(K, C_out).astype(jnp.bfloat16)

    # ---- pad to lane/sublane-friendly shapes ----
    # Lane-dense output: pad C_out up to 128 so every store is an unmasked vst
    # and the MXU drives all result columns; real channels sliced off at the end.
    Cp = _round_up(C_out, LANES)
    Kp = _round_up(K, LANES)
    # TODO(synk): add a K grid axis ("arbitrary", last) with an f32 accumulator
    # scratch when K grows into the thousands; at K=kD*kH*kW*C_in ~ 100 a single
    # Kp=128 block is optimal.

    # Keep at least 2 M-blocks so the "parallel" axis can shard across the two
    # TensorCores on v7x, while keeping tiles large (per-step overhead ~0.35us).
    tm_eff = min(tm, _round_up(pl.cdiv(M, 2), SUBLANES))
    Mp = _round_up(M, tm_eff)
    n_blocks = Mp // tm_eff

    patches = jnp.pad(patches, ((0, Mp - M), (0, Kp - K)))
    w2 = jnp.pad(w2, ((0, Kp - K), (0, Cp - C_out)))
    gamma_p = jnp.pad(gamma.astype(jnp.float32), (0, Cp - C_out))
    beta_p = jnp.pad(beta.astype(jnp.float32), (0, Cp - C_out))

    # VMEM budget (double-buffered in/out tiles) is < 2 MiB at tm=512, Kp=Cp=128;
    # 32 MiB leaves large headroom and fits v5e/v6e (128 MiB) and v7x (64 MiB).
    vmem_limit = 32 * 1024 * 1024

    cost = pl.CostEstimate(
        flops=2 * Mp * Kp * Cp,
        transcendentals=0,
        bytes_accessed=(Mp * Kp * 2 + Kp * Cp * 2 + Mp * Cp * 4
                        + 2 * n_blocks * SUBLANES * Cp * 4))

    # ---- Pallas kernel A: ReLU + matmul + partial BN stats ----
    conv, psum, psq = pl.pallas_call(
        relu_matmul_stats_kernel,
        out_shape=(
            jax.ShapeDtypeStruct((Mp, Cp), jnp.float32),
            jax.ShapeDtypeStruct((n_blocks, SUBLANES, Cp), jnp.float32),
            jax.ShapeDtypeStruct((n_blocks, SUBLANES, Cp), jnp.float32),
        ),
        grid=(n_blocks,),
        in_specs=[
            pl.BlockSpec((tm_eff, Kp), lambda i: (i, 0)),
            pl.BlockSpec((Kp, Cp), lambda i: (0, 0)),
        ],
        out_specs=(
            pl.BlockSpec((tm_eff, Cp), lambda i: (i, 0)),
            pl.BlockSpec((None, SUBLANES, Cp), lambda i: (i, 0, 0)),
            pl.BlockSpec((None, SUBLANES, Cp), lambda i: (i, 0, 0)),
        ),
        compiler_params=pltpu.CompilerParams(
            dimension_semantics=("parallel",),
            vmem_limit_bytes=vmem_limit),
        cost_estimate=cost,
    )(patches, w2)

    # ---- tiny per-channel reduce of partial stats (plain JAX, n_blocks x Cp) ----
    # Padded rows are zero so they add nothing; divide by the true M (biased
    # variance, matching torch BatchNorm3d forward in training mode).
    total = jnp.sum(psum[:, 0, :], axis=0)
    total_sq = jnp.sum(psq[:, 0, :], axis=0)
    mean = total / M
    var = jnp.maximum(total_sq / M - mean * mean, 0.0)
    inv = lax.rsqrt(var + eps)
    scale = (gamma_p * inv).reshape(1, Cp)
    shift = (beta_p - mean * gamma_p * inv).reshape(1, Cp)
    # TODO(synk): PyTorch BatchNorm3d in training mode also updates
    # running_mean/running_var (unbiased variance); only the forward output is
    # produced here.

    # ---- Pallas kernel B: tiled normalize (pipelined; consumes the Mp-padded
    # conv output directly, no conv[:M] slice / extra HBM copy in between) ----
    y = pl.pallas_call(
        bn_apply_kernel,
        out_shape=jax.ShapeDtypeStruct((Mp, Cp), jnp.float32),
        grid=(n_blocks,),
        in_specs=[
            pl.BlockSpec((tm_eff, Cp), lambda i: (i, 0)),
            pl.BlockSpec((1, Cp), lambda i: (0, 0)),
            pl.BlockSpec((1, Cp), lambda i: (0, 0)),
        ],
        out_specs=pl.BlockSpec((tm_eff, Cp), lambda i: (i, 0)),
        compiler_params=pltpu.CompilerParams(
            dimension_semantics=("parallel",),
            vmem_limit_bytes=vmem_limit),
    )(conv, scale, shift)

    # ---- back to PyTorch NCDHW, dropping M / channel padding ----
    y = y[:M, :C_out].reshape(N, Do, Ho, Wo, C_out)
    return jnp.transpose(y, (0, 4, 1, 2, 3))


# --------------------------------------------------------------------------
# Pure-JAX f32 reference (matches the PyTorch module in training mode)
# --------------------------------------------------------------------------
def reference(x, w, gamma, beta, *, stride, padding, eps=1e-5):
    xr = jnp.maximum(x, 0.0)
    y = lax.conv_general_dilated(
        xr, w,
        window_strides=(stride,) * 3,
        padding=[(padding, padding)] * 3,
        dimension_numbers=("NCDHW", "OIDHW", "NCDHW"))
    mean = jnp.mean(y, axis=(0, 2, 3, 4), keepdims=True)
    var = jnp.mean((y - mean) ** 2, axis=(0, 2, 3, 4), keepdims=True)
    g = gamma.reshape(1, -1, 1, 1, 1)
    b = beta.reshape(1, -1, 1, 1, 1)
    return (y - mean) * lax.rsqrt(var + eps) * g + b


if __name__ == "__main__":
    # Module config: ReLUConvBN3D(C_in=4, C_out=8, kernel_size=3, stride=1, padding=1)
    N, C_in, C_out = 2, 4, 8
    D = H = W = 8
    ksize, stride, padding = 3, 1, 1

    key = jax.random.PRNGKey(0)
    kx, kw, kg, kb = jax.random.split(key, 4)
    x = jax.random.normal(kx, (N, C_in, D, H, W), dtype=jnp.float32)
    w = jax.random.normal(kw, (C_out, C_in, ksize, ksize, ksize),
                          dtype=jnp.float32) * 0.1
    gamma = 1.0 + 0.1 * jax.random.normal(kg, (C_out,), dtype=jnp.float32)
    beta = 0.1 * jax.random.normal(kb, (C_out,), dtype=jnp.float32)

    out = relu_conv_bn_3d(x, w, gamma, beta, stride=stride, padding=padding)
    out = jax.block_until_ready(out)

    ref = reference(x, w, gamma, beta, stride=stride, padding=padding)
    assert out.shape == ref.shape, (out.shape, ref.shape)
    # bf16 inputs / f32 accumulation -> loosened tolerance vs the f32 reference.
    assert jnp.allclose(out, ref, rtol=3e-2, atol=3e-2), float(
        jnp.max(jnp.abs(out - ref)))

    print("KERNEL_OK")
</pallas_src>

<mosaic_0001>
module attributes {stable_mosaic.version = 11 : i64} {
  func.func @relu_matmul_stats_kernel(%arg0: i32, %arg1: memref<512x128xbf16, #tpu.memory_space<vmem>>, %arg2: memref<128x128xbf16, #tpu.memory_space<vmem>>, %arg3: memref<512x128xf32, #tpu.memory_space<vmem>>, %arg4: memref<1x8x128xf32, #tpu.memory_space<vmem>>, %arg5: memref<1x8x128xf32, #tpu.memory_space<vmem>>) attributes {dimension_semantics = [#tpu.dimension_semantics<parallel>], iteration_bounds = array<i64: 2>, scalar_prefetch = 0 : i64, scratch_operands = 0 : i64, tpu.core_type = #tpu.core_type<tc>, window_params = [{transform_indices = @transform_0, window_bounds = array<i64: 512, 128>}, {pipeline_mode = #tpu.pipeline_mode<synchronous>, transform_indices = @transform_1, window_bounds = array<i64: 128, 128>}, {transform_indices = @transform_2, window_bounds = array<i64: 512, 128>}, {transform_indices = @transform_3, window_bounds = array<i64: 1, 8, 128>}, {transform_indices = @transform_4, window_bounds = array<i64: 1, 8, 128>}]} {
    %c0 = arith.constant 0 : index
    %c0_0 = arith.constant 0 : index
    %0 = vector.load %arg1[%c0, %c0_0] : memref<512x128xbf16, #tpu.memory_space<vmem>>, vector<512x128xbf16>
    %cst = arith.constant 0.000000e+00 : bf16
    %1 = vector.broadcast %cst : bf16 to vector<512x128xbf16>
    %2 = arith.maximumf %0, %1 : vector<512x128xbf16>
    %c0_1 = arith.constant 0 : index
    %c0_2 = arith.constant 0 : index
    %3 = vector.load %arg2[%c0_1, %c0_2] : memref<128x128xbf16, #tpu.memory_space<vmem>>, vector<128x128xbf16>
    %cst_3 = arith.constant dense<0.000000e+00> : vector<512x128xf32>
    %4 = tpu.matmul %2, %3, %cst_3 {dimension_numbers = #tpu.dot_dimension_numbers<[1], [0], [0], [1], [0, 0, 1, 1], [], []>} : vector<512x128xbf16>, vector<128x128xbf16>, vector<512x128xf32> -> vector<512x128xf32>
    %c0_4 = arith.constant 0 : index
    %c0_5 = arith.constant 0 : index
    %5 = vector.load %arg3[%c0_4, %c0_5] : memref<512x128xf32, #tpu.memory_space<vmem>>, vector<512x128xf32>
    tpu.vector_store %arg3[%c0_4, %c0_5], %4 {strides = array<i32>} : memref<512x128xf32, #tpu.memory_space<vmem>>, vector<512x128xf32>,
    %cst_6 = arith.constant dense<0.000000e+00> : vector<128xf32>
    %6 = vector.multi_reduction <add>, %4, %cst_6 [0] : vector<512x128xf32> to vector<128xf32>
    %7 = vector.shape_cast %6 : vector<128xf32> to vector<1x128xf32>
    %8 = arith.mulf %4, %4 : vector<512x128xf32>
    %cst_7 = arith.constant dense<0.000000e+00> : vector<128xf32>
    %9 = vector.multi_reduction <add>, %8, %cst_7 [0] : vector<512x128xf32> to vector<128xf32>
    %10 = vector.shape_cast %9 : vector<128xf32> to vector<1x128xf32>
    %11 = vector.shape_cast %7 : vector<1x128xf32> to vector<1x128xf32>
    %12 = vector.broadcast %11 : vector<1x128xf32> to vector<8x128xf32>
    %c0_8 = arith.constant 0 : index
    %c0_9 = arith.constant 0 : index
    %c0_10 = arith.constant 0 : index
    %13 = vector.load %arg4[%c0_8, %c0_9, %c0_10] : memref<1x8x128xf32, #tpu.memory_space<vmem>>, vector<1x8x128xf32>
    %14 = vector.shape_cast %13 : vector<1x8x128xf32> to vector<8x128xf32>
    %15 = vector.shape_cast %12 : vector<8x128xf32> to vector<1x8x128xf32>
    tpu.vector_store %arg4[%c0_8, %c0_9, %c0_10], %15 {strides = array<i32>} : memref<1x8x128xf32, #tpu.memory_space<vmem>>, vector<1x8x128xf32>,
    %16 = vector.shape_cast %10 : vector<1x128xf32> to vector<1x128xf32>
    %17 = vector.broadcast %16 : vector<1x128xf32> to vector<8x128xf32>
    %c0_11 = arith.constant 0 : index
    %c0_12 = arith.constant 0 : index
    %c0_13 = arith.constant 0 : index
    %18 = vector.load %arg5[%c0_11, %c0_12, %c0_13] : memref<1x8x128xf32, #tpu.memory_space<vmem>>, vector<1x8x128xf32>
    %19 = vector.shape_cast %18 : vector<1x8x128xf32> to vector<8x128xf32>
    %20 = vector.shape_cast %17 : vector<8x128xf32> to vector<1x8x128xf32>
    tpu.vector_store %arg5[%c0_11, %c0_12, %c0_13], %20 {strides = array<i32>} : memref<1x8x128xf32, #tpu.memory_space<vmem>>, vector<1x8x128xf32>,
    return
  }
  func.func @transform_0(%arg0: i32) -> (i32, i32) {
    %c0_i32 = arith.constant 0 : i32
    %c0_i32_0 = arith.constant 0 : i32
    return %arg0, %c0_i32 : i32, i32
  }
  func.func @transform_1(%arg0: i32) -> (i32, i32) {
    %c0_i32 = arith.constant 0 : i32
    %c0_i32_0 = arith.constant 0 : i32
    %c0_i32_1 = arith.constant 0 : i32
    return %c0_i32, %c0_i32_0 : i32, i32
  }
  func.func @transform_2(%arg0: i32) -> (i32, i32) {
    %c0_i32 = arith.constant 0 : i32
    %c0_i32_0 = arith.constant 0 : i32
    return %arg0, %c0_i32 : i32, i32
  }
  func.func @transform_3(%arg0: i32) -> (i32, i32, i32) {
    %c0_i32 = arith.constant 0 : i32
    %c0_i32_0 = arith.constant 0 : i32
    %c0_i32_1 = arith.constant 0 : i32
    return %arg0, %c0_i32, %c0_i32_0 : i32, i32, i32
  }
  func.func @transform_4(%arg0: i32) -> (i32, i32, i32) {
    %c0_i32 = arith.constant 0 : i32
    %c0_i32_0 = arith.constant 0 : i32
    %c0_i32_1 = arith.constant 0 : i32
    return %arg0, %c0_i32, %c0_i32_0 : i32, i32, i32
  }
}

</mosaic_0001>

<bundles_post_ra>
// kernel: tpu_custom_call.1
= control target key start
LH: loop header
LB: loop body
LE: loop exit
PB: predicated region body
PF: predicated region fallthrough
CT: control target
= control target key end

     0   :  { %10 = vsyncpa [#allocation3], 0  ;;  %s2560_s0 = inlined_call_operand.hbm [shape: bf16[1024,128], index: 0, kind: input, shape index: {}]   ;;  %s2561_s1 = inlined_call_operand.hbm [shape: bf16[128,128], index: 1, kind: input, shape index: {}]   ;;  %s2562_s2 = inlined_call_operand.hbm [shape: f32[1024,128], index: 2, kind: output, shape index: {0}]   ;;  %s2563_s3 = inlined_call_operand.hbm [shape: f32[2,8,128], index: 3, kind: output, shape index: {1}]   ;;  %s2564_s4 = inlined_call_operand.hbm [shape: f32[2,8,128], index: 4, kind: output, shape index: {2}]  }
   0x1   :  { %12 = vsyncpa [#allocation3 + $0x1], 0 }
   0x2   :  { %13 = vsyncpa [#allocation6], 0 }
   0x3   :  { %14 = vsyncpa [#allocation4], 0 }
   0x4   :  { %16 = vsyncpa [#allocation4 + $0x1], 0 }
   0x5   :  { %17 = vsyncpa [#allocation9], 0 }
   0x6   :  { %19 = vsyncpa [#allocation9 + $0x1], 0  ;;  %s1892_s15 = smov 0   ;;  %s1894_s16 = smov 0  }
   0x7   :  { %s1896_s17 = smov 0   ;;  %s1898_s18 = smov 0  }
   0x8 LB: > { %s1913_s19 = sadd.s32 4294967295, %s1855_s18   ;;  %s1387_s20 = sadd.s32 4294967294, %s1855_s18   ;;  %s1855_s18 = sphi %s1898_s18, %s2584_s18   ;;  %s1851_s17 = sphi %s1896_s17, %s2583_s17   ;;  %s1847_s16 = sphi %s1894_s16, %s2582_s16   ;;  %s1843_s15 = sphi %s1892_s15, %s2581_s15  }
   0x9   : > { %p45_p0 = scmp.ne.s32.totalorder %s1847_s16, %s1843_s15  ;;  %p2565_p1 = scmp.eq.s32.totalorder %s1913_s19, 0 }
   0xa   : > { %p96_p3 = scmp.eq.s32.totalorder %s1387_s20, 1  ;;  %p1388_p5 = scmp.ge.s32.totalorder %s1855_s18, 1 }
   0xb   : > { %p1924_p4 = por %p2565_p1, %p45_p0  ;;  %p155_p7 = scmp.lt.s32.totalorder %s1855_s18, 3 }
   0xc   : > { %p1929_p6 = por %p96_p3, %p45_p0  ;;  %s1857_s24 = smov [#allocation5]  }
   0xd   : > { %s2568_s21 = scalar_select %p1924_p4, 1, 0 }
   0xe   : > { %s2569_s22 = scalar_select %p1929_p6, 1, 0 }
   0xf   : > { %p1934_p8 = pnand %p1388_p5, %p155_p7  ;;  %s167_s25 = sshll.u32 %s1857_s24, 4  ;;  %s1938_s25 = int_to_ptr.vmem [resolvable:$true] %s167_s25 }
  0x10   : > { %s1950_s27 = sadd.s32 1, %s1855_s18   ;;  %s32_s28 = sadd.s32 1, %s1851_s17 }
  0x11   : > { %s2570_s23 = scalar_select %p1934_p8, 1, 0 }
  0x12   : > { %p1599_p9 = pneg %p1934_p8  ;;  %s29_s29 = ssub.s32 %s1855_s18, %s1950_s27 }
  0x13   : > { %s1667_s6 = scalar_lea.hbm %s2561_s1, 1024 }
  0x14   : > { %p1945_p11 = pnand %p1599_p9, %p2565_p1  ;;  %p1668_p12 = scmp.ne.s32.totalorder %s2561_s1, %s1667_s6 }
  0x15   : > { %p1674_p5 = scmp.lt.u32.totalorder %s1667_s6, %s2561_s1 }
  0x16   : > { %p1669_p13 = pneg %p1945_p11 }
  0x18   : > { %p1670_p0 = pnand %p1669_p13, %p1668_p12 }
  0x1a   : > { %p1671_p3 = pneg %p1670_p0 }
  0x1c   : > { %p1676_p7 = pnand %p1674_p5, %p1671_p3 }
  0x1e   : > { %1679 = shalt.err (!%p1676_p7)
}
  0x1f   : > { %s1680_s11 = scalar_lea.vmem %s1938_s25, 1024  ;;  %p1688_p2 = scmp.lt.s32.totalorder %s1938_s25, %s1938_s25 }
  0x20   : > { %p1681_p9 = scmp.ne.s32.totalorder %s1938_s25, %s1680_s11  ;;  %p1689_p6 = scmp.lt.s32.totalorder %s1680_s11, %s1680_s11 }
  0x22   : > { %p1683_p10 = pnand %p1681_p9, %p1669_p13  ;;  %p1690_p4 = por %p1689_p6, %p1688_p2 }
  0x24   : > { %p1684_p1 = pneg %p1683_p10 }
  0x26   : > { %p1691_p8 = pnand %p1690_p4, %p1684_p1 }
  0x28   : > { %1694 = shalt.err (!%p1691_p8)
}
  0x29   : > { %s1858_s12 = smov 64   ;;  %s1859_s13 = smov 4  }
  0x2a   : > { %1602 = dma.hbm_to_vmem [thread:$0]  (!%p1945_p11), %s2561_s1, 1024, %s1938_s25, [#allocation6], %s1858_s12, %s1858_s12, %s1859_s13  }
  0x2b   : > { %p30_p1 = scmp.eq.s32.totalorder %s29_s29, 0  ;;  %p39_p2 = scmp.ne.s32.totalorder %s1851_s17, %s1847_s16 }
  0x2c   : > { %p40_p4 = scmp.eq.s32.totalorder %s1855_s18, 0  ;;  %p1618_p6 = scmp.lt.s32.totalorder %s1855_s18, 2 }
  0x2d   : > { %s1984_s30 = scalar_select %p30_p1, %s1851_s17, %s32_s28  }
  0x2e   : > { %p41_p8 = por %p40_p4, %p39_p2  ;;  %p2572_p10 = scmp.eq.s32.totalorder %s1913_s19, 1 }
  0x2f   : > { %s181_s26 = sand.u32 1, %s1851_s17   ;;  %s1449_s6 = sshll.u32 %s1855_s18, 12 }
  0x30   : > { %p1988_p12 = por %p2572_p10, %p39_p2  ;;  %s1391_s7 = sshll.u32 %s181_s26, 8 }
  0x31   : > { %s1997_s10 = scalar_lea.hbm %s2560_s0, %s1449_s6  ;;  %s185_s25 = scalar_lea.vmem [#allocation2], %s1391_s7 }
  0x32   : > { %s192_s28 = sshll.u32 %s185_s25, 4  ;;  %p1999_p11 = pnand %p1618_p6, %p41_p8  ;;  %s2003_s28 = int_to_ptr.vmem [resolvable:$true] %s192_s28 }
  0x33   : > { %s2005_s11 = scalar_lea.sflag [#allocation3], %s181_s26  ;;  %s1695_s14 = scalar_lea.hbm %s1997_s10, 4096 }
  0x34   : > { %p1696_p13 = scmp.ne.s32.totalorder %s1997_s10, %s1695_s14  ;;  %p1697_p0 = pneg %p1999_p11 }
  0x35   : > { %s1700_s7 = scalar_lea.hbm %s2560_s0, 8192  ;;  %p1701_p7 = scmp.lt.u32.totalorder %s1997_s10, %s2560_s0 }
  0x36   : > { %p1698_p3 = pnand %p1697_p0, %p1696_p13  ;;  %p1702_p9 = scmp.lt.u32.totalorder %s1700_s7, %s1695_s14 }
  0x37   : > { %p1704_p2 = scmp.lt.u32.totalorder %s1695_s14, %s1997_s10 }
  0x38   : > { %p1699_p5 = pneg %p1698_p3  ;;  %p1703_p1 = por %p1702_p9, %p1701_p7 }
  0x3a   : > { %p1705_p4 = por %p1704_p2, %p1703_p1 }
  0x3c   : > { %p1706_p6 = pnand %p1705_p4, %p1699_p5 }
  0x3e   : > { %1709 = shalt.err (!%p1706_p6)
}
  0x3f   : > { %s1710_s26 = scalar_lea.vmem %s2003_s28, 4096  ;;  %s1860_s25 = smov [#allocation2]  }
  0x40   : > { %p1711_p8 = scmp.ne.s32.totalorder %s2003_s28, %s1710_s26  ;;  %s1715_s24 = sshll.u32 %s1860_s25, 4  ;;  %s1716_s24 = int_to_ptr.vmem [resolvable:$false] %s1715_s24 }
  0x41   : > { %s1717_s6 = scalar_lea.vmem %s1716_s24, 8192  ;;  %p1718_p3 = scmp.lt.s32.totalorder %s2003_s28, %s1716_s24 }
  0x42   : > { %p1713_p10 = pnand %p1711_p8, %p1697_p0  ;;  %p1719_p7 = scmp.lt.s32.totalorder %s1717_s6, %s1710_s26 }
  0x44   : > { %p1714_p13 = pneg %p1713_p10  ;;  %p1720_p9 = por %p1719_p7, %p1718_p3 }
  0x46   : > { %p1721_p1 = pnand %p1720_p9, %p1714_p13 }
  0x48   : > { %1724 = shalt.err (!%p1721_p1)
}
  0x49   : > { %1606 = dma.hbm_to_vmem [thread:$0]  (!%p1999_p11), %s1997_s10, 4096, %s2003_s28, %s2005_s11, %s1858_s12, %s1858_s12, %s1859_s13  }
  0x4a   : > { %p2575_p0 = scmp.ne.s32.totalorder %s2570_s23, 0 }
  0x4b   : > { %s2039_s14 = sand.u32 (!%p2575_p0), 1, %s1847_s16   ;;  %p2576_p5 = scmp.ne.s32.totalorder (!%p2575_p0), %s2568_s21, 0 }
  0x4c   : > { %204 = sbr.rel (%p2575_p0) target bundleno = 520 (0x208), region = 28  ;;  %s1395_s7 = sshll.u32 (!%p2575_p0), %s2039_s14, 8 }
  0x4d   : > { %s207_s8 = scalar_lea.sflag (!%p2575_p0), [#allocation3], %s2039_s14  ;;  %s2043_s9 = scalar_lea.vmem (!%p2575_p0), [#allocation2], %s1395_s7 }
  0x53   : > { %1826 = dma.done.wait (%p2576_p5), %s207_s8, 4096  }
  0x54   : > { %1828 = vsyncadd (%p2576_p5), %s207_s8, 4294963200  ;;  %p2577_p11 = scmp.eq.s32.totalorder %s1913_s19, 0 }
  0x56   : > { %1830 = dma.done.wait (%p2577_p11), [#allocation6], 1024   ;;  %p2578_p2 = pmov %p2577_p11 }
  0x57   : > { %v1659_v0 = vld [vmem:[#allocation5] sm:$0xff]   ;;  %v1660_v1 = vld [vmem:[#allocation5 + $0x8] sm:$0xff]   ;;  %v1661_v2 = vld [vmem:[#allocation5 + $0x10] sm:$0xff]   ;;  %v1861_v6 = vmov 0   ;;  %s1397_s21 = sshll.u32 %s2039_s14, 9  ;;  %s1450_s12 = sshll.u32 %s1913_s19, 13 }
  0x58   : > { %1832 = vsyncadd (%p2578_p2), [#allocation6], 4294966272  ;;  %1491 = vmatprep.subr.bf16.mxu0 %v1659_v0  ;;  %1571 = vmatprep.subr.bf16.mxu1 %v1659_v0  ;;  %v1662_v3 = vld [vmem:[#allocation5 + $0x18] sm:$0xff]   ;;  %v252_v4 = vld [vmem:[%s2043_s9] sm:$0xf]  ;;  %s2182_s23 = scalar_lea.vmem [#allocation7], %s1397_s21  ;;  %s2339_s29 = scalar_lea.hbm %s2562_s2, %s1450_s12 }
  0x59   : > { %1492 = vmatpush3.bf16.msra.mxu0 %v1659_v0  ;;  %1579 = vmatpush3.bf16.msra.mxu1 %v1659_v0  ;;  %v253_v5 = vld [vmem:[%s2043_s9 + $0x4] sm:$0xf]  ;;  %v316_v7 = vmax.bf16 %v1861_v6, %v252_v4  ;;  %v1664_v11 = vld [vmem:[#allocation5 + $0x28] sm:$0xff]   ;;  %v284_v12 = vld [vmem:[%s2043_s9 + $0x80] sm:$0xf]  ;;  %s1217_s13 = sshll.u32 %s2182_s23, 4  ;;  %s2341_s13 = int_to_ptr.vmem [resolvable:$true] %s1217_s13 }
  0x5a   : > { %1493 = vmatprep.subr.bf16.mxu0 %v1660_v1  ;;  %1572 = vmatprep.subr.bf16.mxu1 %v1660_v1  ;;  %v317_v8 = vmax.bf16 %v1861_v6, %v253_v5  ;;  %v1663_v10 = vld [vmem:[#allocation5 + $0x20] sm:$0xff]   ;;  %v1665_v14 = vld [vmem:[#allocation5 + $0x30] sm:$0xff]   ;;  %v348_v15 = vmax.bf16 %v1861_v6, %v284_v12  ;;  %v254_v17 = vld [vmem:[%s2043_s9 + $0x8] sm:$0xf]  ;;  %s1194_s11 = scalar_lea.sflag [#allocation4], %s2039_s14  ;;  %s1725_s26 = scalar_lea.vmem %s2341_s13, 8192 }
  0x5b   : > { %v285_v13 = vld [vmem:[%s2043_s9 + $0x84] sm:$0xf]  ;;  %v255_v18 = vld [vmem:[%s2043_s9 + $0xc] sm:$0xf]  ;;  %v1666_v20 = vld [vmem:[#allocation5 + $0x38] sm:$0xff]   ;;  %v318_v23 = vmax.bf16 %v1861_v6, %v254_v17  ;;  %p1726_p4 = scmp.ne.s32.totalorder %s2341_s13, %s1725_s26  ;;  %s1862_s25 = smov [#allocation7]  }
  0x5c   : > { %v1400_v9 = vcombine.low %v316_v7, %v317_v8  ;;  %v349_v16 = vmax.bf16 %v1861_v6, %v285_v13  ;;  %v256_v21 = vld [vmem:[%s2043_s9 + $0x10] sm:$0xf]  ;;  %v257_v22 = vld [vmem:[%s2043_s9 + $0x14] sm:$0xf]  ;;  %v319_v24 = vmax.bf16 %v1861_v6, %v255_v18  ;;  %v286_v25 = vld [vmem:[%s2043_s9 + $0x88] sm:$0xf] }
  0x5d   : > { %1494 = vmatpush3.bf16.msra.mxu0 %v1660_v1  ;;  %1580 = vmatpush3.bf16.msra.mxu1 %v1660_v1  ;;  %v287_v26 = vld [vmem:[%s2043_s9 + $0x8c] sm:$0xf]  ;;  %v320_v27 = vmax.bf16 %v1861_v6, %v256_v21  ;;  %v321_v28 = vmax.bf16 %v1861_v6, %v257_v22  ;;  %v288_v29 = vld [vmem:[%s2043_s9 + $0x90] sm:$0xf]  ;;  %v289_v30 = vld [vmem:[%s2043_s9 + $0x94] sm:$0xf]  ;;  %v350_v31 = vmax.bf16 %v1861_v6, %v286_v25  ;;  %p1727_p6 = pnand %p1726_p4, %p1988_p12 }
  0x5e   : > { %1495 = vmatprep.subr.bf16.mxu0 %v1661_v2  ;;  %1573 = vmatprep.subr.bf16.mxu1 %v1661_v2  ;;  %v1416_v19 = vcombine.low %v348_v15, %v349_v16  ;;  %v351_v32 = vmax.bf16 %v1861_v6, %v287_v26  ;;  %v1401_v33 = vcombine.low %v318_v23, %v319_v24  ;;  %v258_v37 = vld [vmem:[%s2043_s9 + $0x18] sm:$0xf]  ;;  %v259_v38 = vld [vmem:[%s2043_s9 + $0x1c] sm:$0xf]  ;;  %v260_v39 = vld [vmem:[%s2043_s9 + $0x20] sm:$0xf] }
  0x5f   : > { %1507 = vmatprep.mubr.bf16.mxu0 %v1400_v9  ;;  %v352_v34 = vmax.bf16 %v1861_v6, %v288_v29  ;;  %v353_v35 = vmax.bf16 %v1861_v6, %v289_v30  ;;  %v1402_v36 = vcombine.low %v320_v27, %v321_v28  ;;  %v261_v40 = vld [vmem:[%s2043_s9 + $0x24] sm:$0xf]  ;;  %v322_v42 = vmax.bf16 %v1861_v6, %v258_v37  ;;  %v290_v45 = vld [vmem:[%s2043_s9 + $0x98] sm:$0xf]  ;;  %v291_v46 = vld [vmem:[%s2043_s9 + $0x9c] sm:$0xf]  ;;  %p1728_p8 = pneg %p1727_p6 }
  0x60   : > { %1539 = vmatprep.mubr.bf16.mxu1 %v1416_v19  ;;  %v1417_v41 = vcombine.low %v350_v31, %v351_v32  ;;  %v323_v43 = vmax.bf16 %v1861_v6, %v259_v38  ;;  %v324_v47 = vmax.bf16 %v1861_v6, %v260_v39  ;;  %v325_v48 = vmax.bf16 %v1861_v6, %v261_v40  ;;  %v292_v49 = vld [vmem:[%s2043_s9 + $0xa0] sm:$0xf]  ;;  %v293_v50 = vld [vmem:[%s2043_s9 + $0xa4] sm:$0xf]  ;;  %v262_v57 = vld [vmem:[%s2043_s9 + $0x28] sm:$0xf] }
  0x61   : > { %1496 = vmatpush3.bf16.msra.mxu0 %v1661_v2  ;;  %1581 = vmatpush3.bf16.msra.mxu1 %v1661_v2  ;;  %v1418_v44 = vcombine.low %v352_v34, %v353_v35  ;;  %v354_v51 = vmax.bf16 %v1861_v6, %v290_v45  ;;  %v355_v52 = vmax.bf16 %v1861_v6, %v291_v46  ;;  %v263_v58 = vld [vmem:[%s2043_s9 + $0x2c] sm:$0xf]  ;;  %v264_v59 = vld [vmem:[%s2043_s9 + $0x30] sm:$0xf]  ;;  %v265_v60 = vld [vmem:[%s2043_s9 + $0x34] sm:$0xf] }
  0x62   : > { %1497 = vmatprep.subr.bf16.mxu0 %v1662_v3  ;;  %1574 = vmatprep.subr.bf16.mxu1 %v1662_v3  ;;  %v1403_v53 = vcombine.low %v322_v42, %v323_v43  ;;  %v356_v54 = vmax.bf16 %v1861_v6, %v292_v49  ;;  %v357_v55 = vmax.bf16 %v1861_v6, %v293_v50  ;;  %v294_v1 = vld [vmem:[%s2043_s9 + $0xa8] sm:$0xf]  ;;  %v295_v2 = vld [vmem:[%s2043_s9 + $0xac] sm:$0xf]  ;;  %v296_v5 = vld [vmem:[%s2043_s9 + $0xb0] sm:$0xf] }
  0x63   : > { %v1404_v56 = vcombine.low %v324_v47, %v325_v48  ;;  %v1419_v61 = vcombine.low %v354_v51, %v355_v52  ;;  %v326_v62 = vmax.bf16 %v1861_v6, %v262_v57  ;;  %v327_v63 = vmax.bf16 %v1861_v6, %v263_v58  ;;  %v297_v7 = vld [vmem:[%s2043_s9 + $0xb4] sm:$0xf]  ;;  %v267_v15 = vld [vmem:[%s2043_s9 + $0x3c] sm:$0xf]  ;;  %v268_v16 = vld [vmem:[%s2043_s9 + $0x40] sm:$0xf] }
  0x64   : > { %v1420_v0 = vcombine.low %v356_v54, %v357_v55  ;;  %v329_v4 = vmax.bf16 %v1861_v6, %v265_v60  ;;  %v358_v8 = vmax.bf16 %v1861_v6, %v294_v1  ;;  %v359_v9 = vmax.bf16 %v1861_v6, %v295_v2  ;;  %v269_v17 = vld [vmem:[%s2043_s9 + $0x44] sm:$0xf]  ;;  %v298_v22 = vld [vmem:[%s2043_s9 + $0xb8] sm:$0xf]  ;;  %v299_v23 = vld [vmem:[%s2043_s9 + $0xbc] sm:$0xf] }
  0x65   : > { %1498 = vmatpush3.bf16.msra.mxu0 %v1662_v3  ;;  %1582 = vmatpush3.bf16.msra.mxu1 %v1662_v3  ;;  %v328_v3 = vmax.bf16 %v1861_v6, %v264_v59  ;;  %v361_v12 = vmax.bf16 %v1861_v6, %v297_v7  ;;  %v332_v24 = vmax.bf16 %v1861_v6, %v268_v16  ;;  %v300_v26 = vld [vmem:[%s2043_s9 + $0xc0] sm:$0xf]  ;;  %v301_v27 = vld [vmem:[%s2043_s9 + $0xc4] sm:$0xf]  ;;  %v270_v34 = vld [vmem:[%s2043_s9 + $0x48] sm:$0xf] }
  0x66   : > { %1499 = vmatprep.subr.bf16.mxu0 %v1663_v10  ;;  %1575 = vmatprep.subr.bf16.mxu1 %v1663_v10  ;;  %v1421_v18 = vcombine.low %v358_v8, %v359_v9  ;;  %v333_v25 = vmax.bf16 %v1861_v6, %v269_v17  ;;  %v362_v28 = vmax.bf16 %v1861_v6, %v298_v22  ;;  %v271_v35 = vld [vmem:[%s2043_s9 + $0x4c] sm:$0xf]  ;;  %v273_v37 = vld [vmem:[%s2043_s9 + $0x54] sm:$0xf]  ;;  %v302_v42 = vld [vmem:[%s2043_s9 + $0xc8] sm:$0xf] }
  0x67   : > { %v1406_v13 = vcombine.low %v328_v3, %v329_v4  ;;  %v363_v29 = vmax.bf16 %v1861_v6, %v299_v23  ;;  %v364_v31 = vmax.bf16 %v1861_v6, %v300_v26  ;;  %v365_v32 = vmax.bf16 %v1861_v6, %v301_v27  ;;  %v303_v43 = vld [vmem:[%s2043_s9 + $0xcc] sm:$0xf]  ;;  %v304_v46 = vld [vmem:[%s2043_s9 + $0xd0] sm:$0xf]  ;;  %v305_v47 = vld [vmem:[%s2043_s9 + $0xd4] sm:$0xf] }
  0x68   : > { %v334_v39 = vmax.bf16 %v1861_v6, %v270_v34  ;;  %v335_v40 = vmax.bf16 %v1861_v6, %v271_v35  ;;  %v337_v45 = vmax.bf16 %v1861_v6, %v273_v37  ;;  %v366_v48 = vmax.bf16 %v1861_v6, %v302_v42  ;;  %v274_v54 = vld [vmem:[%s2043_s9 + $0x58] sm:$0xf]  ;;  %v275_v55 = vld [vmem:[%s2043_s9 + $0x5c] sm:$0xf]  ;;  %v277_v57 = vld [vmem:[%s2043_s9 + $0x64] sm:$0xf] }
  0x69   : > { %1500 = vmatpush3.bf16.msra.mxu0 %v1663_v10  ;;  %1583 = vmatpush3.bf16.msra.mxu1 %v1663_v10  ;;  %v1405_v10 = vcombine.low %v326_v62, %v327_v63  ;;  %v1423_v38 = vcombine.low %v362_v28, %v363_v29  ;;  %v367_v49 = vmax.bf16 %v1861_v6, %v303_v43  ;;  %v306_v62 = vld [vmem:[%s2043_s9 + $0xd8] sm:$0xf]  ;;  %v307_v63 = vld [vmem:[%s2043_s9 + $0xdc] sm:$0xf]  ;;  %v308_v2 = vld [vmem:[%s2043_s9 + $0xe0] sm:$0xf] }
  0x6a   : > { %1501 = vmatprep.subr.bf16.mxu0 %v1664_v11  ;;  %1576 = vmatprep.subr.bf16.mxu1 %v1664_v11  ;;  %v1409_v50 = vcombine.low %v334_v39, %v335_v40  ;;  %v368_v51 = vmax.bf16 %v1861_v6, %v304_v46  ;;  %v369_v52 = vmax.bf16 %v1861_v6, %v305_v47  ;;  %v309_v3 = vld [vmem:[%s2043_s9 + $0xe4] sm:$0xf]  ;;  %v312_v23 = vld [vmem:[%s2043_s9 + $0xf0] sm:$0xf]  ;;  %v314_v37 = vld [vmem:[%s2043_s9 + $0xf8] sm:$0xf] }
  0x6b   : > { %v1425_v58 = vcombine.low %v366_v48, %v367_v49  ;;  %v338_v59 = vmax.bf16 %v1861_v6, %v274_v54  ;;  %v339_v60 = vmax.bf16 %v1861_v6, %v275_v55  ;;  %v341_v1 = vmax.bf16 %v1861_v6, %v277_v57  ;;  %s1729_s24 = sshll.u32 %s1862_s25, 4  ;;  %s1730_s24 = int_to_ptr.vmem [resolvable:$false] %s1729_s24 }
  0x6c   : > { %v370_v4 = vmax.bf16 %v1861_v6, %v306_v62  ;;  %v372_v8 = vmax.bf16 %v1861_v6, %v308_v2  ;;  %v373_v9 = vmax.bf16 %v1861_v6, %v309_v3  ;;  %v376_v28 = vmax.bf16 %v1861_v6, %v312_v23  ;;  %s1731_s6 = scalar_lea.vmem %s1730_s24, 16384  ;;  %p1732_p10 = scmp.lt.s32.totalorder %s2341_s13, %s1730_s24 }
  0x6d   : > { %1502 = vmatpush3.bf16.msra.mxu0 %v1664_v11  ;;  %1584 = vmatpush3.bf16.msra.mxu1 %v1664_v11  ;;  %v360_v11 = vmax.bf16 %v1861_v6, %v296_v5  ;;  %v371_v5 = vmax.bf16 %v1861_v6, %v307_v63  ;;  %v1411_v7 = vcombine.low %v338_v59, %v339_v60  ;;  %p1733_p13 = scmp.lt.s32.totalorder %s1731_s6, %s1725_s26 }
  0x6e   : > { %1503 = vmatprep.subr.bf16.mxu0 %v1665_v14  ;;  %1577 = vmatprep.subr.bf16.mxu1 %v1665_v14  ;;  %v378_v39 = vmax.bf16 %v1861_v6, %v314_v37 }
  0x6f   : > { %v1422_v21 = vcombine.low %v360_v11, %v361_v12  ;;  %v278_v11 = vld [vmem:[%s2043_s9 + $0x68] sm:$0xf]  ;;  %v279_v12 = vld [vmem:[%s2043_s9 + $0x6c] sm:$0xf]  ;;  %p1734_p3 = por %p1733_p13, %p1732_p10 }
  0x70   : > { %v342_v16 = vmax.bf16 %v1861_v6, %v278_v11  ;;  %v343_v17 = vmax.bf16 %v1861_v6, %v279_v12 }
  0x71   : > { %1504 = vmatpush3.bf16.msra.mxu0 %v1665_v14  ;;  %1585 = vmatpush3.bf16.msra.mxu1 %v1665_v14  ;;  %v266_v14 = vld [vmem:[%s2043_s9 + $0x38] sm:$0xf]  ;;  %p1735_p7 = pnand %p1734_p3, %p1728_p8 }
  0x72   : > { %1505 = vmatprep.subr.bf16.mxu0 %v1666_v20  ;;  %1578 = vmatprep.subr.bf16.mxu1 %v1666_v20  ;;  %v330_v19 = vmax.bf16 %v1861_v6, %v266_v14  ;;  %v281_v14 = vld [vmem:[%s2043_s9 + $0x74] sm:$0xf]  ;;  %v1413_v27 = vcombine.low %v342_v16, %v343_v17 }
  0x73   : > { %v345_v22 = vmax.bf16 %v1861_v6, %v281_v14 }
  0x75   : > { %1506 = vmatpush3.bf16.msra.mxu0 %v1666_v20  ;;  %1586 = vmatpush3.bf16.msra.mxu1 %v1666_v20  ;;  %v331_v20 = vmax.bf16 %v1861_v6, %v267_v15  ;;  %v1427_v15 = vcombine.low %v370_v4, %v371_v5 }
  0x77   : > { %v1407_v30 = vcombine.low %v330_v19, %v331_v20  ;;  %v310_v19 = vld [vmem:[%s2043_s9 + $0xe8] sm:$0xf]  ;;  %v311_v20 = vld [vmem:[%s2043_s9 + $0xec] sm:$0xf] }
  0x78   : > { %1508 = vmatmul.mubr.bf16.vlgmr.msra.gmra.mrb[0].mxu0 %v1401_v33  ;;  %1540 = vmatmul.mubr.bf16.vlgmr.msra.gmra.mrb[0].mxu1 %v1417_v41  ;;  %v1408_v33 = vcombine.low %v332_v24, %v333_v25  ;;  %v1424_v41 = vcombine.low %v364_v31, %v365_v32  ;;  %v313_v24 = vld [vmem:[%s2043_s9 + $0xf4] sm:$0xf]  ;;  %v374_v25 = vmax.bf16 %v1861_v6, %v310_v19  ;;  %v282_v31 = vld [vmem:[%s2043_s9 + $0x78] sm:$0xf]  ;;  %v283_v32 = vld [vmem:[%s2043_s9 + $0x7c] sm:$0xf] }
  0x79   : > { %1511 = vmatprep.mubr.bf16.mxu0 %v1402_v36  ;;  %1543 = vmatprep.mubr.bf16.mxu1 %v1418_v44  ;;  %v272_v36 = vld [vmem:[%s2043_s9 + $0x50] sm:$0xf]  ;;  %v375_v26 = vmax.bf16 %v1861_v6, %v311_v20  ;;  %v377_v29 = vmax.bf16 %v1861_v6, %v313_v24  ;;  %v346_v34 = vmax.bf16 %v1861_v6, %v282_v31 }
  0x7a   : > { %v336_v44 = vmax.bf16 %v1861_v6, %v272_v36  ;;  %v347_v35 = vmax.bf16 %v1861_v6, %v283_v32 }
  0x7b   : > { %v1430_v36 = vcombine.low %v376_v28, %v377_v29 }
  0x80   : > { %1512 = vmatmul.mubr.bf16.gmra.mrb[4].mxu0 %v1403_v53  ;;  %1544 = vmatmul.mubr.bf16.gmra.mrb[4].mxu1 %v1419_v61  ;;  %v1410_v53 = vcombine.low %v336_v44, %v337_v45  ;;  %v1426_v61 = vcombine.low %v368_v51, %v369_v52 }
  0x81   : > { %1515 = vmatprep.mubr.bf16.mxu0 %v1404_v56  ;;  %1547 = vmatprep.mubr.bf16.mxu1 %v1420_v0  ;;  %v276_v56 = vld [vmem:[%s2043_s9 + $0x60] sm:$0xf] }
  0x82   : > { %v340_v0 = vmax.bf16 %v1861_v6, %v276_v56 }
  0x88   : > { %1516 = vmatmul.mubr.bf16.gmra.mrb[8].mxu0 %v1405_v10  ;;  %1548 = vmatmul.mubr.bf16.gmra.mrb[8].mxu1 %v1421_v18  ;;  %v1412_v10 = vcombine.low %v340_v0, %v341_v1  ;;  %v1428_v18 = vcombine.low %v372_v8, %v373_v9 }
  0x89   : > { %1519 = vmatprep.mubr.bf16.mxu0 %v1406_v13  ;;  %1551 = vmatprep.mubr.bf16.mxu1 %v1422_v21  ;;  %v280_v13 = vld [vmem:[%s2043_s9 + $0x70] sm:$0xf] }
  0x8a   : > { %v344_v21 = vmax.bf16 %v1861_v6, %v280_v13 }
  0x90   : > { %1520 = vmatmul.mubr.bf16.gmra.mrb[12].mxu0 %v1407_v30  ;;  %1552 = vmatmul.mubr.bf16.gmra.mrb[12].mxu1 %v1423_v38  ;;  %v1414_v30 = vcombine.low %v344_v21, %v345_v22  ;;  %v315_v38 = vld [vmem:[%s2043_s9 + $0xfc] sm:$0xf] }
  0x91   : > { %1523 = vmatprep.mubr.bf16.mxu0 %v1408_v33  ;;  %1555 = vmatprep.mubr.bf16.mxu1 %v1424_v41  ;;  %v1429_v33 = vcombine.low %v374_v25, %v375_v26  ;;  %v379_v40 = vmax.bf16 %v1861_v6, %v315_v38  ;;  %v1415_v41 = vcombine.low %v346_v34, %v347_v35 }
  0x93   : > { %v1431_v42 = vcombine.low %v378_v39, %v379_v40 }
  0x98   : > { %1524 = vmatmul.mubr.bf16.gmra.mrb[16].mxu0 %v1409_v50  ;;  %1556 = vmatmul.mubr.bf16.gmra.mrb[16].mxu1 %v1425_v58 }
  0x99   : > { %1527 = vmatprep.mubr.bf16.mxu0 %v1410_v53  ;;  %1559 = vmatprep.mubr.bf16.mxu1 %v1426_v61 }
  0xa0   : > { %1528 = vmatmul.mubr.bf16.gmra.mrb[20].mxu0 %v1411_v7  ;;  %1560 = vmatmul.mubr.bf16.gmra.mrb[20].mxu1 %v1427_v15 }
  0xa1   : > { %1531 = vmatprep.mubr.bf16.mxu0 %v1412_v10  ;;  %1563 = vmatprep.mubr.bf16.mxu1 %v1428_v18 }
  0xa8   : > { %1532 = vmatmul.mubr.bf16.gmra.mrb[24].mxu0 %v1413_v27  ;;  %1564 = vmatmul.mubr.bf16.gmra.mrb[24].mxu1 %v1429_v33 }
  0xa9   : > { %1535 = vmatprep.mubr.bf16.mxu0 %v1414_v30  ;;  %1567 = vmatprep.mubr.bf16.mxu1 %v1430_v36 }
  0xb0   : > { %1536 = vmatmul.mubr.bf16.gmra.mrb[28].mxu0 %v1415_v41  ;;  %1568 = vmatmul.mubr.bf16.gmra.mrb[28].mxu1 %v1431_v42 }
 0x14b   : > { %v1509_v43 = vpop.f32.mrb[0].mxu0  ;;  %v2187_v46 = vpop.f32.mrb[0].mxu1 }
 0x14c   : > { %927 = vst [vmem:[%s2182_s23 + $0x10] sm:$0xff] %v1509_v43  ;;  %v670_v44 = vpop.f32.mrb[1].mxu0  ;;  %959 = vst [vmem:[%s2182_s23 + $0x110] sm:$0xff] %v2187_v46  ;;  %v2192_v50 = vpop.f32.mrb[1].mxu1  ;;  %v1060_v52 = vmul.f32 %v1509_v43, %v1509_v43 }
 0x14d   : > { %925 = vst [vmem:[%s2182_s23] sm:$0xff] %v670_v44  ;;  %v1510_v6 = vpop.f32.mrb[2].mxu0  ;;  %v1058_v47 = vmul.f32 %v670_v44, %v670_v44  ;;  %957 = vst [vmem:[%s2182_s23 + $0x100] sm:$0xff] %v2192_v50  ;;  %v2196_v51 = vpop.f32.mrb[2].mxu1 }
 0x14e   : > { %928 = vst [vmem:[%s2182_s23 + $0x18] sm:$0xff] %v1510_v6  ;;  %v673_v45 = vpop.f32.mrb[3].mxu0  ;;  %960 = vst [vmem:[%s2182_s23 + $0x118] sm:$0xff] %v2196_v51  ;;  %v2200_v55 = vpop.f32.mrb[3].mxu1  ;;  %v1061_v56 = vmul.f32 %v1510_v6, %v1510_v6 }
 0x14f   : > { %926 = vst [vmem:[%s2182_s23 + $0x8] sm:$0xff] %v673_v45  ;;  %v989_v48 = vadd.f32 %v673_v45, %v670_v44  ;;  %v1059_v49 = vmul.f32 %v673_v45, %v673_v45  ;;  %958 = vst [vmem:[%s2182_s23 + $0x108] sm:$0xff] %v2200_v55 }
 0x151   : > { %v990_v53 = vadd.f32 %v1509_v43, %v989_v48  ;;  %v1122_v54 = vadd.f32 %v1059_v49, %v1058_v47 }
 0x153   : > { %v1123_v57 = vadd.f32 %v1122_v54, %v1060_v52  ;;  %v1513_v58 = vpop.f32.mrb[4].mxu0  ;;  %v991_v59 = vadd.f32 %v1510_v6, %v990_v53  ;;  %v2207_v2 = vpop.f32.mrb[4].mxu1 }
 0x154   : > { %931 = vst [vmem:[%s2182_s23 + $0x30] sm:$0xff] %v1513_v58  ;;  %v686_v60 = vpop.f32.mrb[5].mxu0  ;;  %963 = vst [vmem:[%s2182_s23 + $0x130] sm:$0xff] %v2207_v2  ;;  %v2212_v7 = vpop.f32.mrb[5].mxu1  ;;  %v1064_v9 = vmul.f32 %v1513_v58, %v1513_v58 }
 0x155   : > { %929 = vst [vmem:[%s2182_s23 + $0x20] sm:$0xff] %v686_v60  ;;  %v992_v61 = vadd.f32 %v991_v59, %v686_v60  ;;  %v1062_v62 = vmul.f32 %v686_v60, %v686_v60  ;;  %v1124_v63 = vadd.f32 %v1123_v57, %v1061_v56  ;;  %v1514_v0 = vpop.f32.mrb[6].mxu0  ;;  %961 = vst [vmem:[%s2182_s23 + $0x120] sm:$0xff] %v2212_v7  ;;  %v2216_v8 = vpop.f32.mrb[6].mxu1 }
 0x156   : > { %932 = vst [vmem:[%s2182_s23 + $0x38] sm:$0xff] %v1514_v0  ;;  %v689_v1 = vpop.f32.mrb[7].mxu0  ;;  %964 = vst [vmem:[%s2182_s23 + $0x138] sm:$0xff] %v2216_v8  ;;  %v2220_v12 = vpop.f32.mrb[7].mxu1  ;;  %v1065_v13 = vmul.f32 %v1514_v0, %v1514_v0 }
 0x157   : > { %v1125_v3 = vadd.f32 %v1124_v63, %v1062_v62  ;;  %930 = vst [vmem:[%s2182_s23 + $0x28] sm:$0xff] %v689_v1  ;;  %v993_v4 = vadd.f32 %v992_v61, %v689_v1  ;;  %v1063_v5 = vmul.f32 %v689_v1, %v689_v1  ;;  %962 = vst [vmem:[%s2182_s23 + $0x128] sm:$0xff] %v2220_v12 }
 0x159   : > { %v994_v10 = vadd.f32 %v1513_v58, %v993_v4  ;;  %v1126_v11 = vadd.f32 %v1125_v3, %v1063_v5 }
 0x15b   : > { %v1127_v14 = vadd.f32 %v1126_v11, %v1064_v9  ;;  %v1517_v15 = vpop.f32.mrb[8].mxu0  ;;  %v995_v16 = vadd.f32 %v1514_v0, %v994_v10  ;;  %v2227_v23 = vpop.f32.mrb[8].mxu1 }
 0x15c   : > { %935 = vst [vmem:[%s2182_s23 + $0x50] sm:$0xff] %v1517_v15  ;;  %v702_v17 = vpop.f32.mrb[9].mxu0  ;;  %967 = vst [vmem:[%s2182_s23 + $0x150] sm:$0xff] %v2227_v23  ;;  %v2232_v27 = vpop.f32.mrb[9].mxu1  ;;  %v1068_v29 = vmul.f32 %v1517_v15, %v1517_v15 }
 0x15d   : > { %933 = vst [vmem:[%s2182_s23 + $0x40] sm:$0xff] %v702_v17  ;;  %v996_v18 = vadd.f32 %v995_v16, %v702_v17  ;;  %v1066_v19 = vmul.f32 %v702_v17, %v702_v17  ;;  %v1128_v20 = vadd.f32 %v1127_v14, %v1065_v13  ;;  %v1518_v21 = vpop.f32.mrb[10].mxu0  ;;  %965 = vst [vmem:[%s2182_s23 + $0x140] sm:$0xff] %v2232_v27  ;;  %v2236_v28 = vpop.f32.mrb[10].mxu1 }
 0x15e   : > { %936 = vst [vmem:[%s2182_s23 + $0x58] sm:$0xff] %v1518_v21  ;;  %v705_v22 = vpop.f32.mrb[11].mxu0  ;;  %968 = vst [vmem:[%s2182_s23 + $0x158] sm:$0xff] %v2236_v28  ;;  %v2240_v32 = vpop.f32.mrb[11].mxu1  ;;  %v1069_v33 = vmul.f32 %v1518_v21, %v1518_v21 }
 0x15f   : > { %v1129_v24 = vadd.f32 %v1128_v20, %v1066_v19  ;;  %934 = vst [vmem:[%s2182_s23 + $0x48] sm:$0xff] %v705_v22  ;;  %v997_v25 = vadd.f32 %v996_v18, %v705_v22  ;;  %v1067_v26 = vmul.f32 %v705_v22, %v705_v22  ;;  %966 = vst [vmem:[%s2182_s23 + $0x148] sm:$0xff] %v2240_v32 }
 0x161   : > { %v998_v30 = vadd.f32 %v1517_v15, %v997_v25  ;;  %v1130_v31 = vadd.f32 %v1129_v24, %v1067_v26 }
 0x163   : > { %v1131_v34 = vadd.f32 %v1130_v31, %v1068_v29  ;;  %v1521_v35 = vpop.f32.mrb[12].mxu0  ;;  %v999_v36 = vadd.f32 %v1518_v21, %v998_v30  ;;  %v2247_v43 = vpop.f32.mrb[12].mxu1 }
 0x164   : > { %939 = vst [vmem:[%s2182_s23 + $0x70] sm:$0xff] %v1521_v35  ;;  %v718_v37 = vpop.f32.mrb[13].mxu0  ;;  %971 = vst [vmem:[%s2182_s23 + $0x170] sm:$0xff] %v2247_v43  ;;  %v2252_v47 = vpop.f32.mrb[13].mxu1  ;;  %v1072_v49 = vmul.f32 %v1521_v35, %v1521_v35 }
 0x165   : > { %937 = vst [vmem:[%s2182_s23 + $0x60] sm:$0xff] %v718_v37  ;;  %v1000_v38 = vadd.f32 %v999_v36, %v718_v37  ;;  %v1070_v39 = vmul.f32 %v718_v37, %v718_v37  ;;  %v1132_v40 = vadd.f32 %v1131_v34, %v1069_v33  ;;  %v1522_v41 = vpop.f32.mrb[14].mxu0  ;;  %969 = vst [vmem:[%s2182_s23 + $0x160] sm:$0xff] %v2252_v47  ;;  %v2256_v48 = vpop.f32.mrb[14].mxu1 }
 0x166   : > { %940 = vst [vmem:[%s2182_s23 + $0x78] sm:$0xff] %v1522_v41  ;;  %v721_v42 = vpop.f32.mrb[15].mxu0  ;;  %972 = vst [vmem:[%s2182_s23 + $0x178] sm:$0xff] %v2256_v48  ;;  %v2260_v54 = vpop.f32.mrb[15].mxu1  ;;  %v1073_v56 = vmul.f32 %v1522_v41, %v1522_v41 }
 0x167   : > { %v1133_v44 = vadd.f32 %v1132_v40, %v1070_v39  ;;  %938 = vst [vmem:[%s2182_s23 + $0x68] sm:$0xff] %v721_v42  ;;  %v1001_v6 = vadd.f32 %v1000_v38, %v721_v42  ;;  %v1071_v45 = vmul.f32 %v721_v42, %v721_v42  ;;  %970 = vst [vmem:[%s2182_s23 + $0x168] sm:$0xff] %v2260_v54 }
 0x169   : > { %v1002_v52 = vadd.f32 %v1521_v35, %v1001_v6  ;;  %v1134_v53 = vadd.f32 %v1133_v44, %v1071_v45 }
 0x16b   : > { %v1135_v57 = vadd.f32 %v1134_v53, %v1072_v49  ;;  %v1525_v58 = vpop.f32.mrb[16].mxu0  ;;  %v1003_v59 = vadd.f32 %v1522_v41, %v1002_v52  ;;  %v2267_v3 = vpop.f32.mrb[16].mxu1 }
 0x16c   : > { %943 = vst [vmem:[%s2182_s23 + $0x90] sm:$0xff] %v1525_v58  ;;  %v734_v60 = vpop.f32.mrb[17].mxu0  ;;  %975 = vst [vmem:[%s2182_s23 + $0x190] sm:$0xff] %v2267_v3  ;;  %v2272_v10 = vpop.f32.mrb[17].mxu1  ;;  %v1076_v13 = vmul.f32 %v1525_v58, %v1525_v58 }
 0x16d   : > { %941 = vst [vmem:[%s2182_s23 + $0x80] sm:$0xff] %v734_v60  ;;  %v1004_v61 = vadd.f32 %v1003_v59, %v734_v60  ;;  %v1074_v62 = vmul.f32 %v734_v60, %v734_v60  ;;  %v1136_v63 = vadd.f32 %v1135_v57, %v1073_v56  ;;  %v1526_v0 = vpop.f32.mrb[18].mxu0  ;;  %973 = vst [vmem:[%s2182_s23 + $0x180] sm:$0xff] %v2272_v10  ;;  %v2276_v11 = vpop.f32.mrb[18].mxu1 }
 0x16e   : > { %944 = vst [vmem:[%s2182_s23 + $0x98] sm:$0xff] %v1526_v0  ;;  %v737_v1 = vpop.f32.mrb[19].mxu0  ;;  %976 = vst [vmem:[%s2182_s23 + $0x198] sm:$0xff] %v2276_v11  ;;  %v2280_v16 = vpop.f32.mrb[19].mxu1  ;;  %v1077_v17 = vmul.f32 %v1526_v0, %v1526_v0 }
 0x16f   : > { %v1137_v4 = vadd.f32 %v1136_v63, %v1074_v62  ;;  %942 = vst [vmem:[%s2182_s23 + $0x88] sm:$0xff] %v737_v1  ;;  %v1005_v5 = vadd.f32 %v1004_v61, %v737_v1  ;;  %v1075_v9 = vmul.f32 %v737_v1, %v737_v1  ;;  %974 = vst [vmem:[%s2182_s23 + $0x188] sm:$0xff] %v2280_v16 }
 0x171   : > { %v1006_v14 = vadd.f32 %v1525_v58, %v1005_v5  ;;  %v1138_v15 = vadd.f32 %v1137_v4, %v1075_v9 }
 0x173   : > { %v1139_v18 = vadd.f32 %v1138_v15, %v1076_v13  ;;  %v1529_v19 = vpop.f32.mrb[20].mxu0  ;;  %v1007_v20 = vadd.f32 %v1526_v0, %v1006_v14  ;;  %v2287_v30 = vpop.f32.mrb[20].mxu1 }
 0x174   : > { %947 = vst [vmem:[%s2182_s23 + $0xb0] sm:$0xff] %v1529_v19  ;;  %v750_v21 = vpop.f32.mrb[21].mxu0  ;;  %979 = vst [vmem:[%s2182_s23 + $0x1b0] sm:$0xff] %v2287_v30  ;;  %v2292_v35 = vpop.f32.mrb[21].mxu1  ;;  %v1080_v37 = vmul.f32 %v1529_v19, %v1529_v19 }
 0x175   : > { %945 = vst [vmem:[%s2182_s23 + $0xa0] sm:$0xff] %v750_v21  ;;  %v1008_v22 = vadd.f32 %v1007_v20, %v750_v21  ;;  %v1078_v24 = vmul.f32 %v750_v21, %v750_v21  ;;  %v1140_v25 = vadd.f32 %v1139_v18, %v1077_v17  ;;  %v1530_v26 = vpop.f32.mrb[22].mxu0  ;;  %977 = vst [vmem:[%s2182_s23 + $0x1a0] sm:$0xff] %v2292_v35  ;;  %v2296_v36 = vpop.f32.mrb[22].mxu1 }
 0x176   : > { %948 = vst [vmem:[%s2182_s23 + $0xb8] sm:$0xff] %v1530_v26  ;;  %v753_v29 = vpop.f32.mrb[23].mxu0  ;;  %980 = vst [vmem:[%s2182_s23 + $0x1b8] sm:$0xff] %v2296_v36  ;;  %v2300_v40 = vpop.f32.mrb[23].mxu1  ;;  %v1081_v41 = vmul.f32 %v1530_v26, %v1530_v26 }
 0x177   : > { %v1141_v31 = vadd.f32 %v1140_v25, %v1078_v24  ;;  %946 = vst [vmem:[%s2182_s23 + $0xa8] sm:$0xff] %v753_v29  ;;  %v1009_v33 = vadd.f32 %v1008_v22, %v753_v29  ;;  %v1079_v34 = vmul.f32 %v753_v29, %v753_v29  ;;  %978 = vst [vmem:[%s2182_s23 + $0x1a8] sm:$0xff] %v2300_v40 }
 0x179   : > { %v1010_v38 = vadd.f32 %v1529_v19, %v1009_v33  ;;  %v1142_v39 = vadd.f32 %v1141_v31, %v1079_v34 }
 0x17b   : > { %v1143_v42 = vadd.f32 %v1142_v39, %v1080_v37  ;;  %v1533_v44 = vpop.f32.mrb[24].mxu0  ;;  %v1011_v6 = vadd.f32 %v1530_v26, %v1010_v38  ;;  %v2307_v58 = vpop.f32.mrb[24].mxu1 }
 0x17c   : > { %951 = vst [vmem:[%s2182_s23 + $0xd0] sm:$0xff] %v1533_v44  ;;  %v766_v45 = vpop.f32.mrb[25].mxu0  ;;  %983 = vst [vmem:[%s2182_s23 + $0x1d0] sm:$0xff] %v2307_v58  ;;  %v2312_v62 = vpop.f32.mrb[25].mxu1  ;;  %v1084_v0 = vmul.f32 %v1533_v44, %v1533_v44 }
 0x17d   : > { %949 = vst [vmem:[%s2182_s23 + $0xc0] sm:$0xff] %v766_v45  ;;  %v1012_v49 = vadd.f32 %v1011_v6, %v766_v45  ;;  %v1082_v52 = vmul.f32 %v766_v45, %v766_v45  ;;  %v1144_v53 = vadd.f32 %v1143_v42, %v1081_v41  ;;  %v1534_v56 = vpop.f32.mrb[26].mxu0  ;;  %981 = vst [vmem:[%s2182_s23 + $0x1c0] sm:$0xff] %v2312_v62  ;;  %v2316_v63 = vpop.f32.mrb[26].mxu1 }
 0x17e   : > { %952 = vst [vmem:[%s2182_s23 + $0xd8] sm:$0xff] %v1534_v56  ;;  %v769_v57 = vpop.f32.mrb[27].mxu0  ;;  %984 = vst [vmem:[%s2182_s23 + $0x1d8] sm:$0xff] %v2316_v63  ;;  %v2320_v5 = vpop.f32.mrb[27].mxu1  ;;  %v1085_v9 = vmul.f32 %v1534_v56, %v1534_v56  ;;  %v1090_v6 = vmul.f32 %v2192_v50, %v2192_v50 }
 0x17f   : > { %v1145_v59 = vadd.f32 %v1144_v53, %v1082_v52  ;;  %950 = vst [vmem:[%s2182_s23 + $0xc8] sm:$0xff] %v769_v57  ;;  %v1013_v60 = vadd.f32 %v1012_v49, %v769_v57  ;;  %v1083_v61 = vmul.f32 %v769_v57, %v769_v57  ;;  %982 = vst [vmem:[%s2182_s23 + $0x1c8] sm:$0xff] %v2320_v5 }
 0x181   : > { %v1014_v1 = vadd.f32 %v1533_v44, %v1013_v60  ;;  %v1146_v4 = vadd.f32 %v1145_v59, %v1083_v61 }
 0x183   : > { %v1147_v13 = vadd.f32 %v1146_v4, %v1084_v0  ;;  %v1537_v14 = vpop.f32.mrb[28].mxu0  ;;  %v1015_v15 = vadd.f32 %v1534_v56, %v1014_v1  ;;  %v2329_v24 = vpop.f32.mrb[28].mxu1 }
 0x184   : > { %955 = vst [vmem:[%s2182_s23 + $0xf0] sm:$0xff] %v1537_v14  ;;  %v782_v17 = vpop.f32.mrb[29].mxu0  ;;  %987 = vst [vmem:[%s2182_s23 + $0x1f0] sm:$0xff] %v2329_v24  ;;  %v2334_v31 = vpop.f32.mrb[29].mxu1  ;;  %v1088_v34 = vmul.f32 %v1537_v14, %v1537_v14 }
 0x185   : > { %953 = vst [vmem:[%s2182_s23 + $0xe0] sm:$0xff] %v782_v17  ;;  %v1016_v18 = vadd.f32 %v1015_v15, %v782_v17  ;;  %v1086_v19 = vmul.f32 %v782_v17, %v782_v17  ;;  %v1148_v20 = vadd.f32 %v1147_v13, %v1085_v9  ;;  %v1538_v21 = vpop.f32.mrb[30].mxu0  ;;  %985 = vst [vmem:[%s2182_s23 + $0x1e0] sm:$0xff] %v2334_v31  ;;  %v2345_v33 = vpop.f32.mrb[30].mxu1 }
 0x186   : > { %956 = vst [vmem:[%s2182_s23 + $0xf8] sm:$0xff] %v1538_v21  ;;  %v785_v22 = vpop.f32.mrb[31].mxu0  ;;  %988 = vst [vmem:[%s2182_s23 + $0x1f8] sm:$0xff] %v2345_v33  ;;  %v2349_v39 = vpop.f32.mrb[31].mxu1  ;;  %v1089_v41 = vmul.f32 %v1538_v21, %v1538_v21 }
 0x187   : > { %v1149_v25 = vadd.f32 %v1148_v20, %v1086_v19  ;;  %954 = vst [vmem:[%s2182_s23 + $0xe8] sm:$0xff] %v785_v22  ;;  %v1017_v26 = vadd.f32 %v1016_v18, %v785_v22  ;;  %v1087_v29 = vmul.f32 %v785_v22, %v785_v22  ;;  %986 = vst [vmem:[%s2182_s23 + $0x1e8] sm:$0xff] %v2349_v39 }
 0x189   : > { %v1018_v37 = vadd.f32 %v1537_v14, %v1017_v26  ;;  %v1150_v38 = vadd.f32 %v1149_v25, %v1087_v29 }
 0x18b   : > { %v1151_v42 = vadd.f32 %v1150_v38, %v1088_v34  ;;  %v1019_v44 = vadd.f32 %v1538_v21, %v1018_v37 }
 0x18c   : > { %1738 = shalt.err (!%p1735_p7)
}
 0x18d   : > { %s1739_s7 = scalar_lea.hbm %s2339_s29, 8192  ;;  %s1743_s21 = scalar_lea.hbm %s2562_s2, 16384 }
 0x18e   : > { %p1740_p9 = scmp.ne.s32.totalorder %s2339_s29, %s1739_s7  ;;  %p1744_p5 = scmp.lt.u32.totalorder %s2339_s29, %s2562_s2 }
 0x18f   : > { %p1745_p11 = scmp.lt.u32.totalorder %s1743_s21, %s1739_s7  ;;  %p1747_p4 = scmp.lt.u32.totalorder %s1739_s7, %s2339_s29 }
 0x190   : > { %p1741_p1 = pnand %p1740_p9, %p1988_p12 }
 0x191   : > { %p1746_p2 = por %p1745_p11, %p1744_p5 }
 0x192   : > { %p1742_p0 = pneg %p1741_p1 }
 0x193   : > { %p1748_p6 = por %p1747_p4, %p1746_p2 }
 0x195   : > { %p1749_p8 = pnand %p1748_p6, %p1742_p0 }
 0x197   : > { %1752 = shalt.err (!%p1749_p8)
}
 0x198   : > { %s1863_s10 = smov 128   ;;  %s1864_s28 = smov 8   ;;  %v1020_v45 = vadd.f32 %v1019_v44, %v2192_v50  ;;  %v1152_v49 = vadd.f32 %v1151_v42, %v1089_v41  ;;  %v1091_v56 = vmul.f32 %v2200_v55, %v2200_v55  ;;  %v1092_v57 = vmul.f32 %v2187_v46, %v2187_v46 }
 0x199   : > { %1593 = dma.vmem_to_hbm [thread:$0]  (%p1988_p12), %s2341_s13, 8192, %s2339_s29, %s1194_s11, %s1863_s10, %s1863_s10, %s1864_s28   ;;  %v1093_v61 = vmul.f32 %v2196_v51, %v2196_v51  ;;  %v1094_v50 = vmul.f32 %v2212_v7, %v2212_v7  ;;  %v1095_v14 = vmul.f32 %v2220_v12, %v2220_v12  ;;  %v1099_v25 = vmul.f32 %v2240_v32, %v2240_v32 }
 0x19a   : > { %v1153_v52 = vadd.f32 %v1152_v49, %v1090_v6  ;;  %v1021_v53 = vadd.f32 %v1020_v45, %v2200_v55  ;;  %v1103_v44 = vmul.f32 %v2260_v54, %v2260_v54  ;;  %s1398_s13 = sshll.u32 %s2039_s14, 3  ;;  %s1198_s29 = sand.u32 1, %s1913_s19  }
 0x19b   : > { %s1445_s11 = sshll.u32 %s1913_s19, 7  ;;  %s241_s26 = scalar_lea.vmem [#allocation8], %s1398_s13 }
 0x19c   : > { %v1022_v59 = vadd.f32 %v2187_v46, %v1021_v53  ;;  %v1154_v60 = vadd.f32 %v1153_v52, %v1091_v56  ;;  %v1096_v46 = vmul.f32 %v2207_v2, %v2207_v2  ;;  %s1233_s25 = sshll.u32 %s241_s26, 4  ;;  %s2476_s24 = scalar_lea.vmem [#allocation10], %s1398_s13  ;;  %s2484_s25 = int_to_ptr.vmem [resolvable:$true] %s1233_s25 }
 0x19d   : > { %s1246_s6 = sshll.u32 %s2476_s24, 4  ;;  %s2482_s8 = scalar_lea.hbm %s2563_s3, %s1445_s11  ;;  %s2491_s6 = int_to_ptr.vmem [resolvable:$true] %s1246_s6 }
 0x19e   : > { %v1155_v0 = vadd.f32 %v1154_v60, %v1092_v57  ;;  %v1023_v1 = vadd.f32 %v2196_v51, %v1022_v59  ;;  %v1097_v51 = vmul.f32 %v2216_v8, %v2216_v8  ;;  %v1107_v59 = vmul.f32 %v2280_v16, %v2280_v16  ;;  %s2489_s21 = scalar_lea.hbm %s2564_s4, %s1445_s11  ;;  %s2493_s23 = scalar_lea.sflag [#allocation9], %s1198_s29 }
 0x19f   : > { %s1753_s12 = scalar_lea.vmem %s2484_s25, 128  ;;  %s1865_s10 = smov [#allocation8]  }
 0x1a0   : > { %v1024_v4 = vadd.f32 %v1023_v1, %v2212_v7  ;;  %v1156_v9 = vadd.f32 %v1155_v0, %v1093_v61  ;;  %v1098_v7 = vmul.f32 %v2232_v27, %v2232_v27  ;;  %p1754_p10 = scmp.ne.s32.totalorder %s2484_s25, %s1753_s12  ;;  %s1757_s28 = sshll.u32 %s1865_s10, 4  ;;  %s1758_s28 = int_to_ptr.vmem [resolvable:$false] %s1757_s28 }
 0x1a1   : > { %s1759_s13 = scalar_lea.vmem %s1758_s28, 256  ;;  %p1760_p7 = scmp.lt.s32.totalorder %s2484_s25, %s1758_s28 }
 0x1a2   : > { %v1157_v13 = vadd.f32 %v1156_v9, %v1094_v50  ;;  %v1025_v55 = vadd.f32 %v1024_v4, %v2220_v12  ;;  %p1755_p13 = pnand %p1754_p10, %p1988_p12  ;;  %p1761_p9 = scmp.lt.s32.totalorder %s1759_s13, %s1753_s12 }
 0x1a4   : > { %v1026_v15 = vadd.f32 %v2207_v2, %v1025_v55  ;;  %v1158_v17 = vadd.f32 %v1157_v13, %v1095_v14  ;;  %v1100_v2 = vmul.f32 %v2227_v23, %v2227_v23  ;;  %v1111_v13 = vmul.f32 %v2300_v40, %v2300_v40  ;;  %p1756_p3 = pneg %p1755_p13  ;;  %p1762_p1 = por %p1761_p9, %p1760_p7 }
 0x1a6   : > { %v1159_v18 = vadd.f32 %v1158_v17, %v1096_v46  ;;  %v1027_v19 = vadd.f32 %v2216_v8, %v1026_v15  ;;  %v1101_v8 = vmul.f32 %v2236_v28, %v2236_v28  ;;  %p1763_p0 = pnand %p1762_p1, %p1756_p3 }
 0x1a8   : > { %v1028_v20 = vadd.f32 %v1027_v19, %v2232_v27  ;;  %v1160_v21 = vadd.f32 %v1159_v18, %v1097_v51  ;;  %v1102_v27 = vmul.f32 %v2252_v47, %v2252_v47  ;;  %v1115_v19 = vmul.f32 %v2320_v5, %v2320_v5 }
 0x1aa   : > { %v1161_v22 = vadd.f32 %v1160_v21, %v1098_v7  ;;  %v1029_v12 = vadd.f32 %v1028_v20, %v2240_v32 }
 0x1ac   : > { %v1030_v26 = vadd.f32 %v2227_v23, %v1029_v12  ;;  %v1162_v29 = vadd.f32 %v1161_v22, %v1099_v25  ;;  %v1104_v23 = vmul.f32 %v2247_v43, %v2247_v43  ;;  %v1118_v22 = vmul.f32 %v2334_v31, %v2334_v31 }
 0x1ae   : > { %v1163_v34 = vadd.f32 %v1162_v29, %v1100_v2  ;;  %v1031_v37 = vadd.f32 %v2236_v28, %v1030_v26  ;;  %v1105_v28 = vmul.f32 %v2256_v48, %v2256_v48  ;;  %v1120_v26 = vmul.f32 %v2329_v24, %v2329_v24 }
 0x1b0   : > { %v1032_v38 = vadd.f32 %v1031_v37, %v2252_v47  ;;  %v1164_v41 = vadd.f32 %v1163_v34, %v1101_v8  ;;  %v1106_v47 = vmul.f32 %v2272_v10, %v2272_v10  ;;  %v1121_v8 = vmul.f32 %v2345_v33, %v2345_v33 }
 0x1b2   : > { %v1165_v42 = vadd.f32 %v1164_v41, %v1102_v27  ;;  %v1033_v32 = vadd.f32 %v1032_v38, %v2260_v54 }
 0x1b4   : > { %v1034_v6 = vadd.f32 %v2247_v43, %v1033_v32  ;;  %v1166_v45 = vadd.f32 %v1165_v42, %v1103_v44  ;;  %v1108_v43 = vmul.f32 %v2267_v3, %v2267_v3 }
 0x1b6   : > { %v1167_v49 = vadd.f32 %v1166_v45, %v1104_v23  ;;  %v1035_v52 = vadd.f32 %v2256_v48, %v1034_v6  ;;  %v1109_v48 = vmul.f32 %v2276_v11, %v2276_v11 }
 0x1b8   : > { %v1036_v53 = vadd.f32 %v1035_v52, %v2272_v10  ;;  %v1168_v56 = vadd.f32 %v1167_v49, %v1105_v28  ;;  %v1110_v10 = vmul.f32 %v2292_v35, %v2292_v35 }
 0x1ba   : > { %v1169_v57 = vadd.f32 %v1168_v56, %v1106_v47  ;;  %v1037_v54 = vadd.f32 %v1036_v53, %v2280_v16 }
 0x1bc   : > { %v1038_v60 = vadd.f32 %v2267_v3, %v1037_v54  ;;  %v1170_v61 = vadd.f32 %v1169_v57, %v1107_v59  ;;  %v1112_v3 = vmul.f32 %v2287_v30, %v2287_v30 }
 0x1be   : > { %v1171_v0 = vadd.f32 %v1170_v61, %v1108_v43  ;;  %v1039_v1 = vadd.f32 %v2276_v11, %v1038_v60  ;;  %v1113_v11 = vmul.f32 %v2296_v36, %v2296_v36 }
 0x1c0   : > { %v1040_v50 = vadd.f32 %v1039_v1, %v2292_v35  ;;  %v1172_v4 = vadd.f32 %v1171_v0, %v1109_v48  ;;  %v1114_v35 = vmul.f32 %v2312_v62, %v2312_v62 }
 0x1c2   : > { %v1173_v9 = vadd.f32 %v1172_v4, %v1110_v10  ;;  %v1041_v16 = vadd.f32 %v1040_v50, %v2300_v40 }
 0x1c4   : > { %v1042_v55 = vadd.f32 %v2287_v30, %v1041_v16  ;;  %v1174_v14 = vadd.f32 %v1173_v9, %v1111_v13  ;;  %v1116_v30 = vmul.f32 %v2307_v58, %v2307_v58 }
 0x1c6   : > { %v1175_v46 = vadd.f32 %v1174_v14, %v1112_v3  ;;  %v1043_v15 = vadd.f32 %v2296_v36, %v1042_v55  ;;  %v1117_v36 = vmul.f32 %v2316_v63, %v2316_v63 }
 0x1c8   : > { %v1044_v17 = vadd.f32 %v1043_v15, %v2312_v62  ;;  %v1176_v51 = vadd.f32 %v1175_v46, %v1113_v11 }
 0x1ca   : > { %v1177_v18 = vadd.f32 %v1176_v51, %v1114_v35  ;;  %v1045_v40 = vadd.f32 %v1044_v17, %v2320_v5 }
 0x1cc   : > { %v1046_v7 = vadd.f32 %v2307_v58, %v1045_v40  ;;  %v1178_v20 = vadd.f32 %v1177_v18, %v1115_v19  ;;  %v1119_v58 = vmul.f32 %v2349_v39, %v2349_v39 }
 0x1ce   : > { %v1179_v21 = vadd.f32 %v1178_v20, %v1116_v30  ;;  %v1047_v62 = vadd.f32 %v2316_v63, %v1046_v7 }
 0x1d0   : > { %v1048_v12 = vadd.f32 %v1047_v62, %v2334_v31  ;;  %v1180_v25 = vadd.f32 %v1179_v21, %v1117_v36 }
 0x1d2   : > { %v1181_v5 = vadd.f32 %v1180_v25, %v1118_v22  ;;  %v1049_v2 = vadd.f32 %v1048_v12, %v2349_v39 }
 0x1d4   : > { %v1050_v29 = vadd.f32 %v2329_v24, %v1049_v2  ;;  %v1182_v63 = vadd.f32 %v1181_v5, %v1119_v58 }
 0x1d6   : > { %v1051_v31 = vadd.f32 %v2345_v33, %v1050_v29  ;;  %v1183_v34 = vadd.f32 %v1182_v63, %v1120_v26 }
 0x1d8   : > { %v1052_v37 = vrot.slane %v1051_v31, 4  ;;  %v1184_v27 = vadd.f32 %v1183_v34, %v1121_v8 }
 0x1da   : > { %v1053_v38 = vadd.f32 %v1052_v37, %v1051_v31  ;;  %v1185_v41 = vrot.slane %v1184_v27, 4 }
 0x1dc   : > { %v1054_v39 = vrot.slane %v1053_v38, 2  ;;  %v1186_v42 = vadd.f32 %v1185_v41, %v1184_v27 }
 0x1de   : > { %v1055_v32 = vadd.f32 %v1054_v39, %v1053_v38  ;;  %v1187_v44 = vrot.slane %v1186_v42, 2 }
 0x1e0   : > { %v1056_v24 = vrot.slane %v1055_v32, 1  ;;  %v1188_v23 = vadd.f32 %v1187_v44, %v1186_v42 }
 0x1e2   : > { %v1189_v33 = vrot.slane %v1188_v23, 1  ;;  %v1057_v6 = vadd.f32 %v1056_v24, %v1055_v32 }
 0x1e4   : > { %1191 = vst [vmem:[%s241_s26] sm:$0xff] %v1057_v6  ;;  %v1190_v45 = vadd.f32 %v1189_v33, %v1188_v23 }
 0x1e5   : > { %1766 = shalt.err (!%p1763_p0)
}
 0x1e6   : > { %s1767_s29 = scalar_lea.hbm %s2482_s8, 128  ;;  %s1771_s14 = scalar_lea.hbm %s2563_s3, 256 }
 0x1e7   : > { %p1768_p5 = scmp.ne.s32.totalorder %s2482_s8, %s1767_s29  ;;  %p1772_p4 = scmp.lt.u32.totalorder %s2482_s8, %s2563_s3 }
 0x1e8   : > { %p1773_p6 = scmp.lt.u32.totalorder %s1771_s14, %s1767_s29  ;;  %p1775_p10 = scmp.lt.u32.totalorder %s1767_s29, %s2482_s8 }
 0x1e9   : > { %p1769_p11 = pnand %p1768_p5, %p1988_p12 }
 0x1ea   : > { %p1774_p8 = por %p1773_p6, %p1772_p4 }
 0x1eb   : > { %p1770_p2 = pneg %p1769_p11 }
 0x1ec   : > { %p1776_p13 = por %p1775_p10, %p1774_p8 }
 0x1ee   : > { %p1777_p3 = pnand %p1776_p13, %p1770_p2 }
 0x1f0   : > { %1780 = shalt.err (!%p1777_p3)
}
 0x1f1   : > { %1594 = dma.vmem_to_hbm [thread:$0]  (%p1988_p12), %s2484_s25, 128, %s2482_s8, %s2493_s23   ;;  %1192 = vst [vmem:[%s2476_s24] sm:$0xff] %v1190_v45 }
 0x1f2   : > { %s1781_s9 = scalar_lea.vmem %s2491_s6, 128  ;;  %s1866_s12 = smov [#allocation10]  }
 0x1f3   : > { %p1782_p7 = scmp.ne.s32.totalorder %s2491_s6, %s1781_s9  ;;  %s1785_s10 = sshll.u32 %s1866_s12, 4  ;;  %s1786_s10 = int_to_ptr.vmem [resolvable:$false] %s1785_s10 }
 0x1f4   : > { %s1787_s28 = scalar_lea.vmem %s1786_s10, 256  ;;  %p1788_p0 = scmp.lt.s32.totalorder %s2491_s6, %s1786_s10 }
 0x1f5   : > { %p1783_p9 = pnand %p1782_p7, %p1988_p12  ;;  %p1789_p5 = scmp.lt.s32.totalorder %s1787_s28, %s1781_s9 }
 0x1f7   : > { %p1784_p1 = pneg %p1783_p9  ;;  %p1790_p11 = por %p1789_p5, %p1788_p0 }
 0x1f9   : > { %p1791_p2 = pnand %p1790_p11, %p1784_p1 }
 0x1fb   : > { %1794 = shalt.err (!%p1791_p2)
}
 0x1fc   : > { %s1795_s25 = scalar_lea.hbm %s2489_s21, 128  ;;  %s1799_s13 = scalar_lea.hbm %s2564_s4, 256 }
 0x1fd   : > { %p1796_p4 = scmp.ne.s32.totalorder %s2489_s21, %s1795_s25  ;;  %p1800_p10 = scmp.lt.u32.totalorder %s2489_s21, %s2564_s4 }
 0x1fe   : > { %p1801_p13 = scmp.lt.u32.totalorder %s1799_s13, %s1795_s25  ;;  %p1803_p7 = scmp.lt.u32.totalorder %s1795_s25, %s2489_s21 }
 0x1ff   : > { %p1797_p6 = pnand %p1796_p4, %p1988_p12 }
 0x200   : > { %p1802_p3 = por %p1801_p13, %p1800_p10 }
 0x201   : > { %p1798_p8 = pneg %p1797_p6 }
 0x202   : > { %p1804_p9 = por %p1803_p7, %p1802_p3 }
 0x204   : > { %p1805_p1 = pnand %p1804_p9, %p1798_p8 }
 0x206   : > { %1808 = shalt.err (!%p1805_p1)
}
 0x207   : > { %1595 = dma.vmem_to_hbm [thread:$0]  (%p1988_p12), %s2491_s6, 128, %s2489_s21, %s2493_s23  }
 0x208 PF: > { %s1258_s26 = sand.u32 1, %s1843_s15   ;;  %p2579_p0 = scmp.ne.s32.totalorder %s2569_s22, 0 }
 0x209   : > { %p2580_p5 = scmp.ge.s32.totalorder %s1855_s18, 2  ;;  %s1259_s14 = scalar_lea.sflag [#allocation4], %s1258_s26 }
 0x20b   : > { %p1608_p11 = pnand %p2580_p5, %p2579_p0 }
 0x20d   : > { %1834 = dma.done.wait (!%p1608_p11), %s1259_s14, 8192  }
 0x20e   : > { %1836 = vsyncadd (!%p1608_p11), %s1259_s14, 4294959104  ;;  %s1267_s7 = sand.u32 1, %s1387_s20  }
 0x20f   : > { %s1268_s19 = scalar_lea.sflag [#allocation9], %s1267_s7 }
 0x210   : > { %1838 = dma.done.wait (!%p1608_p11), %s1268_s19, 256  }
 0x211   : > { %1840 = vsyncadd (!%p1608_p11), %s1268_s19, 4294967040  ;;  %p22_p12 = scmp.ge.s32.totalorder %s1950_s27, 4   ;;  %s2581_s15 = smov %s1847_s16 }
 0x212   : > { %s2582_s16 = smov %s1851_s17  ;;  %s2583_s17 = smov %s1984_s30 }
 0x213   : > { %s2584_s18 = smov %s1950_s27  ;;  %24 = sbr.rel (!%p22_p12) target bundleno = 8 (0x8), region = 109 }
 0x21a   :  { %1282 = vsyncpa [#allocation3], 1 }
 0x21b   :  { %1284 = vsyncpa [#allocation3 + $0x1], 1 }
 0x21c   :  { %1285 = vsyncpa [#allocation6], 1 }
 0x21d   :  { %1286 = vsyncpa [#allocation4], 1 }
 0x21e   :  { %1288 = vsyncpa [#allocation4 + $0x1], 1 }
 0x21f   :  { %1289 = vsyncpa [#allocation9], 1 }
 0x220   :  { %1291 = vsyncpa [#allocation9 + $0x1], 1 }

</bundles_post_ra>
